<compile_context>
chip_gen: v7x
topology: tpu7x:2x2x1
jax: 0.10.0
libtpu: 0.0.40
codegen_flags: <defaults>
</compile_context>

<pallas_src>
import numpy as np
import jax
import jax.numpy as jnp
from jax.experimental import pallas as pl
from jax.experimental.pallas import tpu as pltpu


# ---------------------------------------------------------------------------
# Fused kernel: [NNConv(mean) + ELU] * L  ->  mean-pool | max-pool  ->  fc
# ---------------------------------------------------------------------------
def make_ecn_kernel(layout, dims, G, npg):
    """dims = [(Din, Dout), ...]; layout: name -> (row0, rows, cols) in slab."""
    f32, bf16 = jnp.float32, jnp.bfloat16

    def kernel(x_ref, ea_ref, S_ref, T_ref, invdeg_ref, P_ref, invcnt_ref,
               slab_ref, out_ref):
        def param(name):
            r0, nr, nc = layout[name]          # static python ints -> free slice
            return slab_ref[r0:r0 + nr, :nc]

        ea_b   = ea_ref[0].astype(bf16)        # (E, 3)   reused by every layer
        S      = S_ref[0]                      # (E, N)   0/1 bf16 gather
        T0     = T_ref[0]                      # (N, E)   0/1 bf16 scatter-sum
        invdeg = invdeg_ref[0]                 # (N, 1)   f32 1/in-degree
        h      = x_ref[0]                      # (N, Din0) f32 node features

        for l, (Din, Dout) in enumerate(dims):
            w1    = param(f"w1_{l}").astype(bf16)     # (3, 25)  BatchNorm folded
            b1    = param(f"b1_{l}")                  # (1, 25)  f32
            w2    = param(f"w2_{l}").astype(bf16)     # (25, Din*Dout)
            b2    = param(f"b2_{l}")                  # (1, Din*Dout)
            wroot = param(f"wroot_{l}").astype(bf16)  # (Din, Dout)
            bias  = param(f"bias_{l}")                # (1, Dout)
            rexp  = param(f"rexp_{l}").astype(bf16)   # (Din, Din*Dout)  0/1
            rsum  = param(f"rsum_{l}").astype(bf16)   # (Din*Dout, Dout) 0/1
            h_b   = h.astype(bf16)

            # edge MLP: Linear (+folded BN) -> ReLU  (dropout = identity, eval)
            he = jnp.maximum(
                jnp.dot(ea_b, w1, preferred_element_type=f32) + b1, 0.0)      # (E,25)

            # gather source-node features per edge (one-hot bf16 MXU gather)
            xs = jnp.dot(S, h_b, preferred_element_type=f32)                  # (E,Din)

            # per-edge message via 3 MXU ops (no per-channel unroll / rotates)
            We = jnp.dot(he.astype(bf16), w2, preferred_element_type=f32) + b2
            xs_exp = jnp.dot(xs.astype(bf16), rexp, preferred_element_type=f32)
            m = jnp.dot((We * xs_exp).astype(bf16), rsum,
                        preferred_element_type=f32)                           # (E,Dout)

            # mean aggregation: 0/1 scatter-sum on MXU, 1/deg scaling in f32 VPU
            aggr = jnp.dot(T0, m.astype(bf16), preferred_element_type=f32) * invdeg

            out = aggr + jnp.dot(h_b, wroot, preferred_element_type=f32) + bias
            # ELU(alpha=1), f32
            h = jnp.where(out > 0.0, out, jnp.exp(jnp.minimum(out, 0.0)) - 1.0)

        # global mean pool: 0/1 bf16 one-hot matmul + f32 1/count scaling
        xmean = (jnp.dot(P_ref[0], h.astype(bf16), preferred_element_type=f32)
                 * invcnt_ref[0])                                              # (G, D)

        # global max pool: contiguous equal-size graphs -> static sublane-aligned
        # slices (no maskT operand, no per-graph where / -inf sentinel).
        # TODO(synk): ragged graphs need scalar-prefetched per-graph offsets.
        xmax = jnp.concatenate(
            [jnp.max(h[g * npg:(g + 1) * npg, :], axis=0, keepdims=True)
             for g in range(G)], axis=0)                                       # (G, D)

        wfm = param("wfc_mean").astype(bf16)
        wfx = param("wfc_max").astype(bf16)
        bfc_p = param("bfc")
        out_ref[0] = (jnp.dot(xmean.astype(bf16), wfm, preferred_element_type=f32)
                      + jnp.dot(xmax.astype(bf16), wfx, preferred_element_type=f32)
                      + bfc_p)

    return kernel


def ecn_forward(x, edge_attr, S, T0, invdeg, P0, invcnt, slab, layout, dims, npg):
    """One gridded pallas_call over B independent graph-batches."""
    B, N, Din0 = x.shape
    E = edge_attr.shape[1]
    G = P0.shape[1]
    out_dim = layout["bfc"][2]
    bmap = lambda b: (b, 0, 0)

    return pl.pallas_call(
        make_ecn_kernel(layout, dims, G, npg),
        out_shape=jax.ShapeDtypeStruct((B, G, out_dim), jnp.float32),
        grid=(B,),
        in_specs=[
            pl.BlockSpec((1, N, Din0), bmap),            # x
            pl.BlockSpec((1, E, 3), bmap),               # edge_attr
            pl.BlockSpec((1, E, N), bmap),               # S   (0/1 bf16)
            pl.BlockSpec((1, N, E), bmap),               # T0  (0/1 bf16)
            pl.BlockSpec((1, N, 1), bmap),               # 1/deg   (f32)
            pl.BlockSpec((1, G, N), bmap),               # P0  (0/1 bf16)
            pl.BlockSpec((1, G, 1), bmap),               # 1/count (f32)
            pl.BlockSpec(slab.shape, lambda b: (0, 0)),  # shared param slab
        ],
        out_specs=pl.BlockSpec((1, G, out_dim), bmap),
        compiler_params=pltpu.CompilerParams(
            dimension_semantics=("parallel",),           # megacore-shardable (v7x)
            vmem_limit_bytes=32 * 1024 * 1024),
    )(x, edge_attr, S, T0, invdeg, P0, invcnt, slab)


# ---------------------------------------------------------------------------
# Parameters: init, eval-time BatchNorm fold, packing into one f32 slab
# ---------------------------------------------------------------------------
def init_params(key, in_channels, dimensions, out_channels):
    layers = []
    din = in_channels
    for d in dimensions:
        key, k1, k2, k3, k4, k5, k6, k7, k8, k9, k10 = jax.random.split(key, 11)
        layers.append(dict(
            w1=0.3 * jax.random.normal(k1, (3, 25), jnp.float32),
            b1=0.1 * jax.random.normal(k2, (1, 25), jnp.float32),
            gamma=1.0 + 0.1 * jax.random.normal(k3, (1, 25), jnp.float32),
            beta=0.1 * jax.random.normal(k4, (1, 25), jnp.float32),
            rmean=0.05 * jax.random.normal(k5, (1, 25), jnp.float32),
            rvar=1.0 + 0.1 * jax.random.uniform(k6, (1, 25), jnp.float32),
            w2=0.3 * jax.random.normal(k7, (25, din * d), jnp.float32),
            b2=0.1 * jax.random.normal(k8, (1, din * d), jnp.float32),
            wroot=0.3 * jax.random.normal(k9, (din, d), jnp.float32),
            bias=0.1 * jax.random.normal(k10, (1, d), jnp.float32),
        ))
        din = d
    key, kf1, kf2 = jax.random.split(key, 3)
    wfc = 0.3 * jax.random.normal(kf1, (2 * dimensions[-1], out_channels), jnp.float32)
    bfc = 0.1 * jax.random.normal(kf2, (1, out_channels), jnp.float32)
    return layers, wfc, bfc


def fold_bn(layers, eps=1e-5):
    """Fold eval-time BatchNorm into the first edge-MLP Linear (exact algebra)."""
    folded = []
    for p in layers:
        s = p["gamma"] / jnp.sqrt(p["rvar"] + eps)
        folded.append(dict(
            w1f=p["w1"] * s,
            b1f=p["b1"] * s + (p["beta"] - p["rmean"] * s),
            w2=p["w2"], b2=p["b2"], wroot=p["wroot"], bias=p["bias"]))
    return folded


def pack_params(folded, wfc, bfc, width=128):
    """Pack all small parameter arrays into one (rows, 128) f32 slab;
    every block starts on a sublane-aligned (multiple-of-8) row."""
    dims = [p["wroot"].shape for p in folded]
    D = dims[-1][1]
    entries = []
    for l, p in enumerate(folded):
        Din, Dout = dims[l]
        rexp = np.zeros((Din, Din * Dout), np.float32)
        for i in range(Din):
            rexp[i, i * Dout:(i + 1) * Dout] = 1.0
        rsum = np.tile(np.eye(Dout, dtype=np.float32), (Din, 1))
        entries += [(f"w1_{l}", p["w1f"]), (f"b1_{l}", p["b1f"]),
                    (f"w2_{l}", p["w2"]), (f"b2_{l}", p["b2"]),
                    (f"wroot_{l}", p["wroot"]), (f"bias_{l}", p["bias"]),
                    (f"rexp_{l}", rexp), (f"rsum_{l}", rsum)]
    entries += [("wfc_mean", wfc[:D]), ("wfc_max", wfc[D:]), ("bfc", bfc)]

    layout, row = {}, 0
    for name, a in entries:
        a = np.asarray(a, np.float32)
        layout[name] = (row, a.shape[0], a.shape[1])
        row += -(-a.shape[0] // 8) * 8
    slab = np.zeros((max(row, 8), width), np.float32)
    for name, a in entries:
        a = np.asarray(a, np.float32)
        r0, nr, nc = layout[name]
        slab[r0:r0 + nr, :nc] = a
    return jnp.asarray(slab), layout


# ---------------------------------------------------------------------------
# Pure-JAX reference (index-based gather/scatter).  It mirrors the kernel's
# bf16 MXU-operand rounding (r(.)) so the check verifies the graph semantics
# (gather, mean-scatter, BN fold, message formulation, pooling, fc) tightly.
# ---------------------------------------------------------------------------
def ref_forward_one(x, ea, src, dst, batch_vec, G, folded, wfc, bfc):
    r = lambda a: a.astype(jnp.bfloat16).astype(jnp.float32)
    N = x.shape[0]
    E = ea.shape[0]
    h = x
    for p in folded:
        Din, Dout = p["wroot"].shape
        he = jnp.maximum(r(ea) @ r(p["w1f"]) + p["b1f"], 0.0)
        xs = r(h)[src]                                                   # (E, Din)
        We = (r(he) @ r(p["w2"]) + p["b2"]).reshape(E, Din, Dout)
        msgs = jnp.sum(r(We * xs[:, :, None]), axis=1)                   # (E, Dout)
        deg = jnp.zeros((N,), jnp.float32).at[dst].add(1.0)
        invdeg = 1.0 / jnp.maximum(deg, 1.0)
        aggr = (jnp.zeros((N, Dout), jnp.float32).at[dst].add(r(msgs))
                * invdeg[:, None])
        out = aggr + r(h) @ r(p["wroot"]) + p["bias"]
        h = jnp.where(out > 0.0, out, jnp.exp(jnp.minimum(out, 0.0)) - 1.0)
    D = h.shape[1]
    counts = jnp.zeros((G,), jnp.float32).at[batch_vec].add(1.0)
    xmean = (jnp.zeros((G, D), jnp.float32).at[batch_vec].add(r(h))
             * (1.0 / counts)[:, None])
    xmax = jnp.stack([jnp.max(jnp.where((batch_vec == g)[:, None], h,
                                        jnp.finfo(jnp.float32).min), axis=0)
                      for g in range(G)])
    return r(xmean) @ r(wfc[:D]) + r(xmax) @ r(wfc[D:]) + bfc


if __name__ == "__main__":
    # ---- synthetic batched graph data -------------------------------------
    in_channels, dimensions, out_channels = 4, [8, 8], 3
    B, G, npg = 2, 2, 8                       # batches, graphs/batch, nodes/graph
    N = G * npg

    # ring edges (both directions) within each graph — contiguous, equal-sized
    src_l, dst_l = [], []
    for g in range(G):
        off = g * npg
        for i in range(npg):
            a, b = off + i, off + (i + 1) % npg
            src_l += [a, b]
            dst_l += [b, a]
    src = np.array(src_l, np.int32)
    dst = np.array(dst_l, np.int32)
    E = src.shape[0]
    batch_vec = np.repeat(np.arange(G, dtype=np.int32), npg)

    # dense 0/1 structural operators (exact in bf16) + f32 reciprocal scalings
    S_np = np.zeros((E, N), np.float32); S_np[np.arange(E), src] = 1.0
    deg = np.zeros(N, np.float32); np.add.at(deg, dst, 1.0)
    T_np = np.zeros((N, E), np.float32); T_np[dst, np.arange(E)] = 1.0
    invdeg_np = (1.0 / np.maximum(deg, 1.0)).reshape(N, 1).astype(np.float32)
    P_np = np.zeros((G, N), np.float32); P_np[batch_vec, np.arange(N)] = 1.0
    counts = np.bincount(batch_vec, minlength=G).astype(np.float32)
    invcnt_np = (1.0 / counts).reshape(G, 1).astype(np.float32)

    S      = jnp.asarray(np.broadcast_to(S_np, (B, E, N)), dtype=jnp.bfloat16)
    T0     = jnp.asarray(np.broadcast_to(T_np, (B, N, E)), dtype=jnp.bfloat16)
    P0     = jnp.asarray(np.broadcast_to(P_np, (B, G, N)), dtype=jnp.bfloat16)
    invdeg = jnp.asarray(np.broadcast_to(invdeg_np, (B, N, 1)))
    invcnt = jnp.asarray(np.broadcast_to(invcnt_np, (B, G, 1)))

    key = jax.random.PRNGKey(0)
    key, kx, ke = jax.random.split(key, 3)
    x = jax.random.normal(kx, (B, N, in_channels), jnp.float32)
    edge_attr = jax.random.normal(ke, (B, E, 3), jnp.float32)

    # parameters: init -> fold eval-time BatchNorm -> pack into one slab
    layers, wfc, bfc = init_params(key, in_channels, dimensions, out_channels)
    folded = fold_bn(layers)
    slab, layout = pack_params(folded, wfc, bfc)
    dims = [p["wroot"].shape for p in folded]     # [(4, 8), (8, 8)]

    # ---- fused Pallas forward ---------------------------------------------
    out = ecn_forward(x, edge_attr, S, T0, invdeg, P0, invcnt,
                      slab, layout, dims, npg)
    out = jax.block_until_ready(out)

    # ---- sanity check vs. index-based reference ----------------------------
    ref = jnp.stack([
        ref_forward_one(x[b], edge_attr[b], jnp.asarray(src), jnp.asarray(dst),
                        jnp.asarray(batch_vec), G, folded, wfc, bfc)
        for b in range(B)])
    np.testing.assert_allclose(np.asarray(out), np.asarray(ref),
                               rtol=5e-3, atol=5e-3)

    print("KERNEL_OK")
</pallas_src>

<mosaic_0001>
module attributes {stable_mosaic.version = 11 : i64} {
  func.func @kernel(%arg0: i32, %arg1: memref<1x16x4xf32, #tpu.memory_space<vmem>>, %arg2: memref<1x32x3xf32, #tpu.memory_space<vmem>>, %arg3: memref<1x32x16xbf16, #tpu.memory_space<vmem>>, %arg4: memref<1x16x32xbf16, #tpu.memory_space<vmem>>, %arg5: memref<1x16x1xf32, #tpu.memory_space<vmem>>, %arg6: memref<1x2x16xbf16, #tpu.memory_space<vmem>>, %arg7: memref<1x2x1xf32, #tpu.memory_space<vmem>>, %arg8: memref<280x128xf32, #tpu.memory_space<vmem>>, %arg9: memref<1x2x3xf32, #tpu.memory_space<vmem>>) attributes {dimension_semantics = [#tpu.dimension_semantics<parallel>], iteration_bounds = array<i64: 2>, scalar_prefetch = 0 : i64, scratch_operands = 0 : i64, tpu.core_type = #tpu.core_type<tc>, window_params = [{transform_indices = @transform_0, window_bounds = array<i64: 1, 16, 4>}, {transform_indices = @transform_1, window_bounds = array<i64: 1, 32, 3>}, {transform_indices = @transform_2, window_bounds = array<i64: 1, 32, 16>}, {transform_indices = @transform_3, window_bounds = array<i64: 1, 16, 32>}, {transform_indices = @transform_4, window_bounds = array<i64: 1, 16, 1>}, {transform_indices = @transform_5, window_bounds = array<i64: 1, 2, 16>}, {transform_indices = @transform_6, window_bounds = array<i64: 1, 2, 1>}, {pipeline_mode = #tpu.pipeline_mode<synchronous>, transform_indices = @transform_7, window_bounds = array<i64: 280, 128>}, {transform_indices = @transform_8, window_bounds = array<i64: 1, 2, 3>}]} {
    %c0 = arith.constant 0 : index
    %c0_0 = arith.constant 0 : index
    %c0_1 = arith.constant 0 : index
    %0 = vector.load %arg2[%c0, %c0_0, %c0_1] : memref<1x32x3xf32, #tpu.memory_space<vmem>>, vector<1x32x3xf32>
    %1 = vector.shape_cast %0 : vector<1x32x3xf32> to vector<32x3xf32>
    %2 = arith.truncf %1 : vector<32x3xf32> to vector<32x3xbf16>
    %c0_2 = arith.constant 0 : index
    %c0_3 = arith.constant 0 : index
    %c0_4 = arith.constant 0 : index
    %3 = vector.load %arg3[%c0_2, %c0_3, %c0_4] : memref<1x32x16xbf16, #tpu.memory_space<vmem>>, vector<1x32x16xbf16>
    %4 = vector.shape_cast %3 : vector<1x32x16xbf16> to vector<32x16xbf16>
    %c0_5 = arith.constant 0 : index
    %c0_6 = arith.constant 0 : index
    %c0_7 = arith.constant 0 : index
    %5 = vector.load %arg4[%c0_5, %c0_6, %c0_7] : memref<1x16x32xbf16, #tpu.memory_space<vmem>>, vector<1x16x32xbf16>
    %6 = vector.shape_cast %5 : vector<1x16x32xbf16> to vector<16x32xbf16>
    %c0_8 = arith.constant 0 : index
    %c0_9 = arith.constant 0 : index
    %c0_10 = arith.constant 0 : index
    %7 = vector.load %arg5[%c0_8, %c0_9, %c0_10] : memref<1x16x1xf32, #tpu.memory_space<vmem>>, vector<1x16x1xf32>
    %8 = vector.shape_cast %7 : vector<1x16x1xf32> to vector<16x1xf32>
    %c0_11 = arith.constant 0 : index
    %c0_12 = arith.constant 0 : index
    %c0_13 = arith.constant 0 : index
    %9 = vector.load %arg1[%c0_11, %c0_12, %c0_13] : memref<1x16x4xf32, #tpu.memory_space<vmem>>, vector<1x16x4xf32>
    %10 = vector.shape_cast %9 : vector<1x16x4xf32> to vector<16x4xf32>
    %c0_14 = arith.constant 0 : index
    %c0_15 = arith.constant 0 : index
    %11 = vector.load %arg8[%c0_14, %c0_15] : memref<280x128xf32, #tpu.memory_space<vmem>>, vector<3x25xf32>
    %12 = arith.truncf %11 : vector<3x25xf32> to vector<3x25xbf16>
    %c8 = arith.constant 8 : index
    %c0_16 = arith.constant 0 : index
    %13 = vector.load %arg8[%c8, %c0_16] : memref<280x128xf32, #tpu.memory_space<vmem>>, vector<1x25xf32>
    %c16 = arith.constant 16 : index
    %c0_17 = arith.constant 0 : index
    %14 = vector.load %arg8[%c16, %c0_17] : memref<280x128xf32, #tpu.memory_space<vmem>>, vector<25x32xf32>
    %15 = arith.truncf %14 : vector<25x32xf32> to vector<25x32xbf16>
    %c48 = arith.constant 48 : index
    %c0_18 = arith.constant 0 : index
    %16 = vector.load %arg8[%c48, %c0_18] : memref<280x128xf32, #tpu.memory_space<vmem>>, vector<1x32xf32>
    %c56 = arith.constant 56 : index
    %c0_19 = arith.constant 0 : index
    %17 = vector.load %arg8[%c56, %c0_19] : memref<280x128xf32, #tpu.memory_space<vmem>>, vector<4x8xf32>
    %18 = arith.truncf %17 : vector<4x8xf32> to vector<4x8xbf16>
    %c64 = arith.constant 64 : index
    %c0_20 = arith.constant 0 : index
    %19 = vector.load %arg8[%c64, %c0_20] : memref<280x128xf32, #tpu.memory_space<vmem>>, vector<1x8xf32>
    %c72 = arith.constant 72 : index
    %c0_21 = arith.constant 0 : index
    %20 = vector.load %arg8[%c72, %c0_21] : memref<280x128xf32, #tpu.memory_space<vmem>>, vector<4x32xf32>
    %21 = arith.truncf %20 : vector<4x32xf32> to vector<4x32xbf16>
    %c80 = arith.constant 80 : index
    %c0_22 = arith.constant 0 : index
    %22 = vector.load %arg8[%c80, %c0_22] : memref<280x128xf32, #tpu.memory_space<vmem>>, vector<32x8xf32>
    %23 = arith.truncf %22 : vector<32x8xf32> to vector<32x8xbf16>
    %24 = arith.truncf %10 : vector<16x4xf32> to vector<16x4xbf16>
    %cst = arith.constant dense<0.000000e+00> : vector<32x25xf32>
    %25 = tpu.matmul %2, %12, %cst {dimension_numbers = #tpu.dot_dimension_numbers<[1], [0], [0], [1], [0, 0, 1, 1], [], []>} : vector<32x3xbf16>, vector<3x25xbf16>, vector<32x25xf32> -> vector<32x25xf32>
    %26 = vector.broadcast %13 : vector<1x25xf32> to vector<32x25xf32>
    %27 = arith.addf %25, %26 : vector<32x25xf32>
    %cst_23 = arith.constant 0.000000e+00 : f32
    %28 = vector.broadcast %cst_23 : f32 to vector<32x25xf32>
    %29 = arith.maximumf %27, %28 : vector<32x25xf32>
    %cst_24 = arith.constant dense<0.000000e+00> : vector<32x4xf32>
    %30 = tpu.matmul %4, %24, %cst_24 {dimension_numbers = #tpu.dot_dimension_numbers<[1], [0], [0], [1], [0, 0, 1, 1], [], []>} : vector<32x16xbf16>, vector<16x4xbf16>, vector<32x4xf32> -> vector<32x4xf32>
    %31 = arith.truncf %29 : vector<32x25xf32> to vector<32x25xbf16>
    %cst_25 = arith.constant dense<0.000000e+00> : vector<32x32xf32>
    %32 = tpu.matmul %31, %15, %cst_25 {dimension_numbers = #tpu.dot_dimension_numbers<[1], [0], [0], [1], [0, 0, 1, 1], [], []>} : vector<32x25xbf16>, vector<25x32xbf16>, vector<32x32xf32> -> vector<32x32xf32>
    %33 = vector.broadcast %16 : vector<1x32xf32> to vector<32x32xf32>
    %34 = arith.addf %32, %33 : vector<32x32xf32>
    %35 = arith.truncf %30 : vector<32x4xf32> to vector<32x4xbf16>
    %cst_26 = arith.constant dense<0.000000e+00> : vector<32x32xf32>
    %36 = tpu.matmul %35, %21, %cst_26 {dimension_numbers = #tpu.dot_dimension_numbers<[1], [0], [0], [1], [0, 0, 1, 1], [], []>} : vector<32x4xbf16>, vector<4x32xbf16>, vector<32x32xf32> -> vector<32x32xf32>
    %37 = arith.mulf %34, %36 : vector<32x32xf32>
    %38 = arith.truncf %37 : vector<32x32xf32> to vector<32x32xbf16>
    %cst_27 = arith.constant dense<0.000000e+00> : vector<32x8xf32>
    %39 = tpu.matmul %38, %23, %cst_27 {dimension_numbers = #tpu.dot_dimension_numbers<[1], [0], [0], [1], [0, 0, 1, 1], [], []>} : vector<32x32xbf16>, vector<32x8xbf16>, vector<32x8xf32> -> vector<32x8xf32>
    %40 = arith.truncf %39 : vector<32x8xf32> to vector<32x8xbf16>
    %cst_28 = arith.constant dense<0.000000e+00> : vector<16x8xf32>
    %41 = tpu.matmul %6, %40, %cst_28 {dimension_numbers = #tpu.dot_dimension_numbers<[1], [0], [0], [1], [0, 0, 1, 1], [], []>} : vector<16x32xbf16>, vector<32x8xbf16>, vector<16x8xf32> -> vector<16x8xf32>
    %42 = vector.broadcast %8 : vector<16x1xf32> to vector<16x8xf32>
    %43 = arith.mulf %41, %42 : vector<16x8xf32>
    %cst_29 = arith.constant dense<0.000000e+00> : vector<16x8xf32>
    %44 = tpu.matmul %24, %18, %cst_29 {dimension_numbers = #tpu.dot_dimension_numbers<[1], [0], [0], [1], [0, 0, 1, 1], [], []>} : vector<16x4xbf16>, vector<4x8xbf16>, vector<16x8xf32> -> vector<16x8xf32>
    %45 = arith.addf %43, %44 : vector<16x8xf32>
    %46 = vector.broadcast %19 : vector<1x8xf32> to vector<16x8xf32>
    %47 = arith.addf %45, %46 : vector<16x8xf32>
    %cst_30 = arith.constant 0.000000e+00 : f32
    %48 = vector.broadcast %cst_30 : f32 to vector<16x8xf32>
    %49 = arith.cmpf ogt, %47, %48 : vector<16x8xf32>
    %cst_31 = arith.constant 0.000000e+00 : f32
    %50 = vector.broadcast %cst_31 : f32 to vector<16x8xf32>
    %51 = arith.minimumf %47, %50 : vector<16x8xf32>
    %52 = math.exp %51 : vector<16x8xf32>
    %cst_32 = arith.constant 1.000000e+00 : f32
    %53 = vector.broadcast %cst_32 : f32 to vector<16x8xf32>
    %54 = arith.subf %52, %53 : vector<16x8xf32>
    %55 = arith.select %49, %47, %54 : vector<16x8xi1>, vector<16x8xf32>
    %c112 = arith.constant 112 : index
    %c0_33 = arith.constant 0 : index
    %56 = vector.load %arg8[%c112, %c0_33] : memref<280x128xf32, #tpu.memory_space<vmem>>, vector<3x25xf32>
    %57 = arith.truncf %56 : vector<3x25xf32> to vector<3x25xbf16>
    %c120 = arith.constant 120 : index
    %c0_34 = arith.constant 0 : index
    %58 = vector.load %arg8[%c120, %c0_34] : memref<280x128xf32, #tpu.memory_space<vmem>>, vector<1x25xf32>
    %c128 = arith.constant 128 : index
    %c0_35 = arith.constant 0 : index
    %59 = vector.load %arg8[%c128, %c0_35] : memref<280x128xf32, #tpu.memory_space<vmem>>, vector<25x64xf32>
    %60 = arith.truncf %59 : vector<25x64xf32> to vector<25x64xbf16>
    %c160 = arith.constant 160 : index
    %c0_36 = arith.constant 0 : index
    %61 = vector.load %arg8[%c160, %c0_36] : memref<280x128xf32, #tpu.memory_space<vmem>>, vector<1x64xf32>
    %c168 = arith.constant 168 : index
    %c0_37 = arith.constant 0 : index
    %62 = vector.load %arg8[%c168, %c0_37] : memref<280x128xf32, #tpu.memory_space<vmem>>, vector<8x8xf32>
    %63 = arith.truncf %62 : vector<8x8xf32> to vector<8x8xbf16>
    %c176 = arith.constant 176 : index
    %c0_38 = arith.constant 0 : index
    %64 = vector.load %arg8[%c176, %c0_38] : memref<280x128xf32, #tpu.memory_space<vmem>>, vector<1x8xf32>
    %c184 = arith.constant 184 : index
    %c0_39 = arith.constant 0 : index
    %65 = vector.load %arg8[%c184, %c0_39] : memref<280x128xf32, #tpu.memory_space<vmem>>, vector<8x64xf32>
    %66 = arith.truncf %65 : vector<8x64xf32> to vector<8x64xbf16>
    %c192 = arith.constant 192 : index
    %c0_40 = arith.constant 0 : index
    %67 = vector.load %arg8[%c192, %c0_40] : memref<280x128xf32, #tpu.memory_space<vmem>>, vector<64x8xf32>
    %68 = arith.truncf %67 : vector<64x8xf32> to vector<64x8xbf16>
    %69 = arith.truncf %55 : vector<16x8xf32> to vector<16x8xbf16>
    %cst_41 = arith.constant dense<0.000000e+00> : vector<32x25xf32>
    %70 = tpu.matmul %2, %57, %cst_41 {dimension_numbers = #tpu.dot_dimension_numbers<[1], [0], [0], [1], [0, 0, 1, 1], [], []>} : vector<32x3xbf16>, vector<3x25xbf16>, vector<32x25xf32> -> vector<32x25xf32>
    %71 = vector.broadcast %58 : vector<1x25xf32> to vector<32x25xf32>
    %72 = arith.addf %70, %71 : vector<32x25xf32>
    %cst_42 = arith.constant 0.000000e+00 : f32
    %73 = vector.broadcast %cst_42 : f32 to vector<32x25xf32>
    %74 = arith.maximumf %72, %73 : vector<32x25xf32>
    %cst_43 = arith.constant dense<0.000000e+00> : vector<32x8xf32>
    %75 = tpu.matmul %4, %69, %cst_43 {dimension_numbers = #tpu.dot_dimension_numbers<[1], [0], [0], [1], [0, 0, 1, 1], [], []>} : vector<32x16xbf16>, vector<16x8xbf16>, vector<32x8xf32> -> vector<32x8xf32>
    %76 = arith.truncf %74 : vector<32x25xf32> to vector<32x25xbf16>
    %cst_44 = arith.constant dense<0.000000e+00> : vector<32x64xf32>
    %77 = tpu.matmul %76, %60, %cst_44 {dimension_numbers = #tpu.dot_dimension_numbers<[1], [0], [0], [1], [0, 0, 1, 1], [], []>} : vector<32x25xbf16>, vector<25x64xbf16>, vector<32x64xf32> -> vector<32x64xf32>
    %78 = vector.broadcast %61 : vector<1x64xf32> to vector<32x64xf32>
    %79 = arith.addf %77, %78 : vector<32x64xf32>
    %80 = arith.truncf %75 : vector<32x8xf32> to vector<32x8xbf16>
    %cst_45 = arith.constant dense<0.000000e+00> : vector<32x64xf32>
    %81 = tpu.matmul %80, %66, %cst_45 {dimension_numbers = #tpu.dot_dimension_numbers<[1], [0], [0], [1], [0, 0, 1, 1], [], []>} : vector<32x8xbf16>, vector<8x64xbf16>, vector<32x64xf32> -> vector<32x64xf32>
    %82 = arith.mulf %79, %81 : vector<32x64xf32>
    %83 = arith.truncf %82 : vector<32x64xf32> to vector<32x64xbf16>
    %cst_46 = arith.constant dense<0.000000e+00> : vector<32x8xf32>
    %84 = tpu.matmul %83, %68, %cst_46 {dimension_numbers = #tpu.dot_dimension_numbers<[1], [0], [0], [1], [0, 0, 1, 1], [], []>} : vector<32x64xbf16>, vector<64x8xbf16>, vector<32x8xf32> -> vector<32x8xf32>
    %85 = arith.truncf %84 : vector<32x8xf32> to vector<32x8xbf16>
    %cst_47 = arith.constant dense<0.000000e+00> : vector<16x8xf32>
    %86 = tpu.matmul %6, %85, %cst_47 {dimension_numbers = #tpu.dot_dimension_numbers<[1], [0], [0], [1], [0, 0, 1, 1], [], []>} : vector<16x32xbf16>, vector<32x8xbf16>, vector<16x8xf32> -> vector<16x8xf32>
    %87 = vector.broadcast %8 : vector<16x1xf32> to vector<16x8xf32>
    %88 = arith.mulf %86, %87 : vector<16x8xf32>
    %cst_48 = arith.constant dense<0.000000e+00> : vector<16x8xf32>
    %89 = tpu.matmul %69, %63, %cst_48 {dimension_numbers = #tpu.dot_dimension_numbers<[1], [0], [0], [1], [0, 0, 1, 1], [], []>} : vector<16x8xbf16>, vector<8x8xbf16>, vector<16x8xf32> -> vector<16x8xf32>
    %90 = arith.addf %88, %89 : vector<16x8xf32>
    %91 = vector.broadcast %64 : vector<1x8xf32> to vector<16x8xf32>
    %92 = arith.addf %90, %91 : vector<16x8xf32>
    %cst_49 = arith.constant 0.000000e+00 : f32
    %93 = vector.broadcast %cst_49 : f32 to vector<16x8xf32>
    %94 = arith.cmpf ogt, %92, %93 : vector<16x8xf32>
    %cst_50 = arith.constant 0.000000e+00 : f32
    %95 = vector.broadcast %cst_50 : f32 to vector<16x8xf32>
    %96 = arith.minimumf %92, %95 : vector<16x8xf32>
    %97 = math.exp %96 : vector<16x8xf32>
    %cst_51 = arith.constant 1.000000e+00 : f32
    %98 = vector.broadcast %cst_51 : f32 to vector<16x8xf32>
    %99 = arith.subf %97, %98 : vector<16x8xf32>
    %100 = arith.select %94, %92, %99 : vector<16x8xi1>, vector<16x8xf32>
    %c0_52 = arith.constant 0 : index
    %c0_53 = arith.constant 0 : index
    %c0_54 = arith.constant 0 : index
    %101 = vector.load %arg6[%c0_52, %c0_53, %c0_54] : memref<1x2x16xbf16, #tpu.memory_space<vmem>>, vector<1x2x16xbf16>
    %102 = vector.shape_cast %101 : vector<1x2x16xbf16> to vector<2x16xbf16>
    %103 = arith.truncf %100 : vector<16x8xf32> to vector<16x8xbf16>
    %cst_55 = arith.constant dense<0.000000e+00> : vector<2x8xf32>
    %104 = tpu.matmul %102, %103, %cst_55 {dimension_numbers = #tpu.dot_dimension_numbers<[1], [0], [0], [1], [0, 0, 1, 1], [], []>} : vector<2x16xbf16>, vector<16x8xbf16>, vector<2x8xf32> -> vector<2x8xf32>
    %c0_56 = arith.constant 0 : index
    %c0_57 = arith.constant 0 : index
    %c0_58 = arith.constant 0 : index
    %105 = vector.load %arg7[%c0_56, %c0_57, %c0_58] : memref<1x2x1xf32, #tpu.memory_space<vmem>>, vector<1x2x1xf32>
    %106 = vector.shape_cast %105 : vector<1x2x1xf32> to vector<2x1xf32>
    %107 = vector.broadcast %106 : vector<2x1xf32> to vector<2x8xf32>
    %108 = arith.mulf %104, %107 : vector<2x8xf32>
    %109 = vector.extract_strided_slice %100 {offsets = [0, 0], sizes = [8, 8], strides = [1, 1]} : vector<16x8xf32> to vector<8x8xf32>
    %cst_59 = arith.constant dense<0xFF800000> : vector<8xf32>
    %110 = vector.multi_reduction <maximumf>, %109, %cst_59 [0] : vector<8x8xf32> to vector<8xf32>
    %111 = vector.shape_cast %110 : vector<8xf32> to vector<1x8xf32>
    %112 = vector.extract_strided_slice %100 {offsets = [8, 0], sizes = [8, 8], strides = [1, 1]} : vector<16x8xf32> to vector<8x8xf32>
    %cst_60 = arith.constant dense<0xFF800000> : vector<8xf32>
    %113 = vector.multi_reduction <maximumf>, %112, %cst_60 [0] : vector<8x8xf32> to vector<8xf32>
    %114 = vector.shape_cast %113 : vector<8xf32> to vector<1x8xf32>
    %115 = tpu.concatenate %111, %114 in 0 : vector<1x8xf32>, vector<1x8xf32> -> vector<2x8xf32>
    %c256 = arith.constant 256 : index
    %c0_61 = arith.constant 0 : index
    %116 = vector.load %arg8[%c256, %c0_61] : memref<280x128xf32, #tpu.memory_space<vmem>>, vector<8x3xf32>
    %117 = arith.truncf %116 : vector<8x3xf32> to vector<8x3xbf16>
    %c264 = arith.constant 264 : index
    %c0_62 = arith.constant 0 : index
    %118 = vector.load %arg8[%c264, %c0_62] : memref<280x128xf32, #tpu.memory_space<vmem>>, vector<8x3xf32>
    %119 = arith.truncf %118 : vector<8x3xf32> to vector<8x3xbf16>
    %c272 = arith.constant 272 : index
    %c0_63 = arith.constant 0 : index
    %120 = vector.load %arg8[%c272, %c0_63] : memref<280x128xf32, #tpu.memory_space<vmem>>, vector<1x3xf32>
    %121 = arith.truncf %108 : vector<2x8xf32> to vector<2x8xbf16>
    %cst_64 = arith.constant dense<0.000000e+00> : vector<2x3xf32>
    %122 = tpu.matmul %121, %117, %cst_64 {dimension_numbers = #tpu.dot_dimension_numbers<[1], [0], [0], [1], [0, 0, 1, 1], [], []>} : vector<2x8xbf16>, vector<8x3xbf16>, vector<2x3xf32> -> vector<2x3xf32>
    %123 = arith.truncf %115 : vector<2x8xf32> to vector<2x8xbf16>
    %cst_65 = arith.constant dense<0.000000e+00> : vector<2x3xf32>
    %124 = tpu.matmul %123, %119, %cst_65 {dimension_numbers = #tpu.dot_dimension_numbers<[1], [0], [0], [1], [0, 0, 1, 1], [], []>} : vector<2x8xbf16>, vector<8x3xbf16>, vector<2x3xf32> -> vector<2x3xf32>
    %125 = arith.addf %122, %124 : vector<2x3xf32>
    %126 = vector.broadcast %120 : vector<1x3xf32> to vector<2x3xf32>
    %127 = arith.addf %125, %126 : vector<2x3xf32>
    %c0_66 = arith.constant 0 : index
    %c0_67 = arith.constant 0 : index
    %c0_68 = arith.constant 0 : index
    %128 = vector.load %arg9[%c0_66, %c0_67, %c0_68] : memref<1x2x3xf32, #tpu.memory_space<vmem>>, vector<1x2x3xf32>
    %129 = vector.shape_cast %128 : vector<1x2x3xf32> to vector<2x3xf32>
    %130 = vector.shape_cast %127 : vector<2x3xf32> to vector<1x2x3xf32>
    tpu.vector_store %arg9[%c0_66, %c0_67, %c0_68], %130 {strides = array<i32>} : memref<1x2x3xf32, #tpu.memory_space<vmem>>, vector<1x2x3xf32>,
    return
  }
  func.func @transform_0(%arg0: i32) -> (i32, i32, i32) {
    %c0_i32 = arith.constant 0 : i32
    %c0_i32_0 = arith.constant 0 : i32
    %c0_i32_1 = arith.constant 0 : i32
    return %arg0, %c0_i32, %c0_i32_0 : i32, i32, i32
  }
  func.func @transform_1(%arg0: i32) -> (i32, i32, i32) {
    %c0_i32 = arith.constant 0 : i32
    %c0_i32_0 = arith.constant 0 : i32
    %c0_i32_1 = arith.constant 0 : i32
    return %arg0, %c0_i32, %c0_i32_0 : i32, i32, i32
  }
  func.func @transform_2(%arg0: i32) -> (i32, i32, i32) {
    %c0_i32 = arith.constant 0 : i32
    %c0_i32_0 = arith.constant 0 : i32
    %c0_i32_1 = arith.constant 0 : i32
    return %arg0, %c0_i32, %c0_i32_0 : i32, i32, i32
  }
  func.func @transform_3(%arg0: i32) -> (i32, i32, i32) {
    %c0_i32 = arith.constant 0 : i32
    %c0_i32_0 = arith.constant 0 : i32
    %c0_i32_1 = arith.constant 0 : i32
    return %arg0, %c0_i32, %c0_i32_0 : i32, i32, i32
  }
  func.func @transform_4(%arg0: i32) -> (i32, i32, i32) {
    %c0_i32 = arith.constant 0 : i32
    %c0_i32_0 = arith.constant 0 : i32
    %c0_i32_1 = arith.constant 0 : i32
    return %arg0, %c0_i32, %c0_i32_0 : i32, i32, i32
  }
  func.func @transform_5(%arg0: i32) -> (i32, i32, i32) {
    %c0_i32 = arith.constant 0 : i32
    %c0_i32_0 = arith.constant 0 : i32
    %c0_i32_1 = arith.constant 0 : i32
    return %arg0, %c0_i32, %c0_i32_0 : i32, i32, i32
  }
  func.func @transform_6(%arg0: i32) -> (i32, i32, i32) {
    %c0_i32 = arith.constant 0 : i32
    %c0_i32_0 = arith.constant 0 : i32
    %c0_i32_1 = arith.constant 0 : i32
    return %arg0, %c0_i32, %c0_i32_0 : i32, i32, i32
  }
  func.func @transform_7(%arg0: i32) -> (i32, i32) {
    %c0_i32 = arith.constant 0 : i32
    %c0_i32_0 = arith.constant 0 : i32
    %c0_i32_1 = arith.constant 0 : i32
    return %c0_i32, %c0_i32_0 : i32, i32
  }
  func.func @transform_8(%arg0: i32) -> (i32, i32, i32) {
    %c0_i32 = arith.constant 0 : i32
    %c0_i32_0 = arith.constant 0 : i32
    %c0_i32_1 = arith.constant 0 : i32
    return %arg0, %c0_i32, %c0_i32_0 : i32, i32, i32
  }
}

</mosaic_0001>

<bundles_post_ra>
// kernel: tpu_custom_call.1
= control target key start
LH: loop header
LB: loop body
LE: loop exit
PB: predicated region body
PF: predicated region fallthrough
CT: control target
= control target key end

     0   :  { %13 = vsyncpa [#allocation3], 0  ;;  %s2422_s0 = inlined_call_operand.vmem [shape: f32[2,16,4], index: 0, kind: input, shape index: {}]   ;;  %s2423_s1 = inlined_call_operand.vmem [shape: f32[2,32,3], index: 1, kind: input, shape index: {}]   ;;  %s2424_s2 = inlined_call_operand.vmem [shape: bf16[2,32,16], index: 2, kind: input, shape index: {}]   ;;  %s2425_s3 = inlined_call_operand.vmem [shape: bf16[2,16,32], index: 3, kind: input, shape index: {}]   ;;  %s2426_s4 = inlined_call_operand.vmem [shape: f32[2,16,1], index: 4, kind: input, shape index: {}]   ;;  %s2427_s5 = inlined_call_operand.vmem [shape: bf16[2,2,16], index: 5, kind: input, shape index: {}]   ;;  %s2428_s6 = inlined_call_operand.vmem [shape: f32[2,2,1], index: 6, kind: input, shape index: {}]   ;;  %s2429_s7 = inlined_call_operand.hbm [shape: f32[280,128], index: 7, kind: input, shape index: {}]   ;;  %s2430_s8 = inlined_call_operand.hbm [shape: f32[2,2,3], index: 8, kind: output, shape index: {}]  }
   0x1   :  { %14 = vsyncpa [#allocation4], 0 }
   0x2   :  { %16 = vsyncpa [#allocation4 + $0x1], 0  ;;  %s2149_s27 = smov 0   ;;  %s2151_s28 = smov 0  }
   0x3   :  { %s2153_s29 = smov 0   ;;  %s2155_s30 = smov 0  }
   0x4 LB: > { %s2170_s9 = sadd.s32 4294967295, %s2094_s30   ;;  %s1691_s10 = sadd.s32 4294967294, %s2094_s30   ;;  %s2094_s30 = sphi %s2155_s30, %s2446_s30   ;;  %s2090_s29 = sphi %s2153_s29, %s2445_s29   ;;  %s2086_s28 = sphi %s2151_s28, %s2444_s28   ;;  %s2082_s27 = sphi %s2149_s27, %s2443_s27  }
   0x5   : > { %s2174_s11 = sadd.s32 1, %s2094_s30   ;;  %s232_s12 = sadd.s32 1, %s2090_s29 }
   0x6   : > { %s229_s13 = ssub.s32 %s2094_s30, %s2174_s11  ;;  %p242_p0 = scmp.ne.s32.totalorder %s2090_s29, %s2086_s28 }
   0x7   : > { %p230_p1 = scmp.eq.s32.totalorder %s229_s13, 0  ;;  %p243_p2 = scmp.eq.s32.totalorder %s2170_s9, 1 }
   0x8   : > { %p248_p3 = scmp.ne.s32.totalorder %s2086_s28, %s2082_s27  ;;  %p249_p4 = scmp.eq.s32.totalorder %s1691_s10, 1 }
   0x9   : > { %s2185_s14 = scalar_select %p230_p1, %s2090_s29, %s232_s12  }
   0xa   : > { %p2187_p5 = por %p243_p2, %p242_p0  ;;  %p2191_p6 = por %p249_p4, %p248_p3 }
   0xb   : > { %p1692_p7 = scmp.ge.s32.totalorder %s2094_s30, 1  ;;  %p256_p8 = scmp.lt.s32.totalorder %s2094_s30, 3 }
   0xc   : > { %s2434_s15 = scalar_select %p2187_p5, 1, 0 }
   0xd   : > { %s2435_s16 = scalar_select %p2191_p6, 1, 0 }
   0xe   : > { %p2431_p9 = scmp.eq.s32.totalorder %s2170_s9, 0  ;;  %p2198_p10 = pnand %p1692_p7, %p256_p8 }
   0xf   : > { %s2096_s18 = smov [#allocation2]   ;;  %s2000_s23 = scalar_lea.hbm %s2429_s7, 4480 }
  0x10   : > { %s2436_s17 = scalar_select %p2198_p10, 1, 0 }
  0x11   : > { %s268_s19 = sshll.u32 %s2096_s18, 4  ;;  %p1937_p11 = pneg %p2198_p10  ;;  %s269_s19 = int_to_ptr.vmem [resolvable:$true] %s268_s19 }
  0x12   : > { %p2001_p13 = scmp.ne.s32.totalorder %s2429_s7, %s2000_s23  ;;  %p2007_p3 = scmp.lt.u32.totalorder %s2000_s23, %s2429_s7 }
  0x13   : > { %p2206_p12 = pnand %p2431_p9, %p1937_p11 }
  0x15   : > { %p2002_p0 = pneg %p2206_p12 }
  0x17   : > { %p2003_p1 = pnand %p2002_p0, %p2001_p13 }
  0x19   : > { %p2004_p2 = pneg %p2003_p1 }
  0x1b   : > { %p2009_p4 = pnand %p2007_p3, %p2004_p2 }
  0x1d   : > { %2012 = shalt.err (!%p2009_p4)
}
  0x1e   : > { %s2013_s12 = scalar_lea.vmem %s269_s19, 4480  ;;  %p2021_p9 = scmp.lt.s32.totalorder %s269_s19, %s269_s19 }
  0x1f   : > { %p2014_p7 = scmp.ne.s32.totalorder %s269_s19, %s2013_s12  ;;  %p2022_p6 = scmp.lt.s32.totalorder %s2013_s12, %s2013_s12 }
  0x21   : > { %p2016_p8 = pnand %p2014_p7, %p2002_p0  ;;  %p2023_p5 = por %p2022_p6, %p2021_p9 }
  0x23   : > { %p2017_p11 = pneg %p2016_p8 }
  0x25   : > { %p2024_p10 = pnand %p2023_p5, %p2017_p11 }
  0x27   : > { %2027 = shalt.err (!%p2024_p10)
}
  0x28   : > { %s2097_s13 = smov 128   ;;  %s2098_s18 = smov 8  }
  0x29   : > { %1940 = dma.hbm_to_vmem [thread:$0]  (!%p2206_p12), %s2429_s7, 4480, %s269_s19, [#allocation3], %s2097_s13, %s2097_s13, %s2098_s18  }
  0x2a   : > { %p2438_p13 = scmp.ne.s32.totalorder %s2436_s17, 0 }
  0x2b   : > { %p2439_p1 = scmp.eq.s32.totalorder (!%p2438_p13), %s2170_s9, 0 }
  0x2c   : > { %337 = sbr.rel (%p2438_p13) target bundleno = 2333 (0x91d), region = 52 }
  0x33   : > { %2073 = dma.done.wait (%p2439_p1), [#allocation3], 4480   ;;  %p2440_p0 = pmov %p2439_p1 }
  0x34   : > { %p398_p5 = scmp.lt.s32.totalorder %s2170_s9, 1  ;;  %vm480_vm0 = vcmask 1040384   ;;  %vm481_vm1 = vcmask 1041408   ;;  %v2099_v0 = vmov 65535   ;;  %v447_v4 = vld [vmem:[#allocation2] sm:$0x7] }
  0x35   : > { %2075 = vsyncadd (%p2440_p0), [#allocation3], 4294962816  ;;  %v482_v1 = vsel %vm480_vm0, 4294967295, %v2099_v0  ;;  %v448_v7 = vpack.c.bf16 %v447_v4, %v447_v4  ;;  %vm550_vm2 = vcmask 130048   ;;  %vm473_vm3 = vcmask 23552   ;;  %v450_v19 = vld [vmem:[#allocation2 + $0x10] sm:$0xff] }
  0x36   : > { %s2234_s23 = scalar_select %p398_p5, %s2170_s9, 1  ;;  %v2253_v5 = vsel %vm481_vm1, %v482_v1, 0  ;;  %vm619_vm4 = vcmask 1043456   ;;  %v460_v17 = vld [vmem:[#allocation2 + $0x48] sm:$0xf]  ;;  %v451_v20 = vld [vmem:[#allocation2 + $0x18] sm:$0xff] }
  0x37   : > { %v485_v11 = vand.u32 %v2253_v5, %v448_v7  ;;  %v461_v18 = vpack.c.bf16 %v460_v17, %v460_v17  ;;  %v621_v21 = vsel %vm619_vm4, 4294967295, %v2099_v0  ;;  %v454_v22 = vpack.c.bf16 %v451_v20, %v450_v19  ;;  %v452_v24 = vld [vmem:[#allocation2 + $0x20] sm:$0xff]  ;;  %v453_v25 = vld [vmem:[#allocation2 + $0x28] sm:$0x1]  ;;  %v462_v50 = vld [vmem:[#allocation2 + $0x50] sm:$0xff]  ;;  %p2441_p9 = scmp.ne.s32.totalorder %s2434_s15, 0 }
  0x38   : > { %s2237_s20 = sshll.u32 %s2234_s23, 4  ;;  %s1755_s17 = sshll.u32 %s2234_s23, 5  ;;  %v455_v26 = vpack.c.bf16 %v453_v25, %v452_v24  ;;  %vm620_vm5 = vcmask 1044480   ;;  %v1709_v30 = vld [vmem:[#allocation2 + $0x8] ss:$0 sm:$0xff]  ;;  %vm677_vm6 = vcmask 31744  }
  0x39   : > { %s402_s25 = scalar_lea.vmem %s2422_s0, %s2237_s20  ;;  %s412_s12 = scalar_lea.vmem %s2424_s2, %s2237_s20  ;;  %1811 = vmatprep.subr.bf16.mxu0 %v485_v11  ;;  %v685_v23 = vsel %vm481_vm1, %v461_v18, 0  ;;  %v2279_v27 = vsel %vm620_vm5, %v621_v21, 0  ;;  %vm612_vm7 = vcmask 203776   ;;  %v463_v51 = vld [vmem:[#allocation2 + $0x58] sm:$0xff]  ;;  %v464_v53 = vld [vmem:[#allocation2 + $0x60] sm:$0xff]  ;;  %v465_v54 = vld [vmem:[#allocation2 + $0x68] sm:$0xff] }
  0x3a   : > { %s407_s21 = scalar_lea.vmem %s2423_s1, %s1755_s17  ;;  %v445_v2 = vld [vmem:[%s402_s25] sm:$0xff]  ;;  %v446_v3 = vld [vmem:[%s402_s25 + $0x8] sm:$0xff]  ;;  %1812 = vmatpush3.bf16.msra.mxu0 %v485_v11  ;;  %v624_v28 = vand.u32 %v2279_v27, %v455_v26  ;;  %v466_v52 = vpack.c.bf16 %v463_v51, %v462_v50  ;;  %v467_v55 = vpack.c.bf16 %v465_v54, %v464_v53  ;;  %v1716_v60 = vld [vmem:[#allocation2 + $0x30] ss:$0 sm:$0xff]  ;;  %vm742_vm8 = vcmask 261120   ;;  %s1757_s22 = sshll.u32 %s2234_s23, 3 }
  0x3b   : > { %v2255_v6 = vpack.c.bf16 %v446_v3, %v445_v2  ;;  %v2257_v8 = vld [vmem:[%s412_s12] sm:$0xff]   ;;  %v432_v10 = vld [vmem:[%s407_s21 + $0x8] sm:$0xff]  ;;  %v433_v14 = vld [vmem:[%s407_s21 + $0x10] sm:$0xff]  ;;  %1823 = vmatprep.subr.bf16.mxu0 %v454_v22  ;;  %v2100_v17 = vmov 0.0   ;;  %s417_s24 = scalar_lea.vmem %s2425_s3, %s1757_s22  ;;  %vm2101_vm9 = vmmov 0   ;;  %s422_s10 = scalar_lea.vmem %s2426_s4, %s2237_s20  ;;  %v2102_v21 = vmov 0  }
  0x3c   : > { %v431_v9 = vld [vmem:[%s407_s21] sm:$0xff]  ;;  %v2263_v13 = vld [vmem:[%s412_s12 + $0x8] sm:$0xff]   ;;  %1819 = vmatprep.mubr.msk.bf16.mxu1 %vm550_vm2, %v2257_v8  ;;  %v434_v15 = vld [vmem:[%s407_s21 + $0x18] sm:$0xff]  ;;  %1987 = vset.pattern.permute.xlu0 %v2102_v21  ;;  %vm1131_vm12 = vcmask 64512   ;;  %vm1196_vm13 = vcmask 523264   ;;  %s1708_s20 = sshll.u32 %s2234_s23, 1  ;;  %s425_s17 = scalar_lea.vmem %s2427_s5, %s2234_s23 }
  0x3d   : > { %1817 = vmatprep.subr.bf16.mxu1 %v2255_v6  ;;  %v2261_v12 = vpack.c.bf16 %v432_v10, %v431_v9  ;;  %v2270_v16 = vpack.c.bf16 %v434_v15, %v433_v14  ;;  %1988 = vset.pattern.permute.xlu1 %v2102_v21  ;;  %v928_v24 = vld [vmem:[#allocation2 + $0x70] sm:$0x7]  ;;  %v1729_v53 = vld [vmem:[#allocation2 + $0x78] ss:$0 sm:$0xff]  ;;  %s429_s18 = scalar_lea.vmem %s2428_s6, %s1708_s20  ;;  %s395_s23 = sand.u32 1, %s2086_s28  }
  0x3e   : > { %1818 = vmatpush3.bf16.msra.mxu1 %v2255_v6  ;;  %s1697_s19 = sshll.u32 %s395_s23, 1 }
  0x3f   : > { %1813 = vmatprep.mubr.msk.bf16.mxu0 %vm473_vm3, %v2261_v12  ;;  %1929 = vmatprep.subr.msk.bf16.mxu1 %vm481_vm1, %v461_v18  ;;  %v457_v18 = vld [vmem:[#allocation2 + $0x38] sm:$0xf]  ;;  %s397_s25 = scalar_lea.vmem [#allocation5], %s1697_s19 }
  0x40   : > { %1814 = vmatmul.mubr.msk.bf16.vlgmr.msra.gmra.mrb[0].mxu0 %vm473_vm3, %v2270_v16  ;;  %v458_v19 = vpack.c.bf16 %v457_v18, %v457_v18  ;;  %s1551_s26 = sshll.u32 %s397_s25, 4  ;;  %s2382_s26 = int_to_ptr.vmem [resolvable:$true] %s1551_s26 }
  0x41   : > { %1820 = vmatmul.mubr.msk.bf16.vlgmr.msra.gmra.mrb[0].mxu1 %vm550_vm2, %v2263_v13  ;;  %1824 = vmatpush3.bf16.msra.mxu0 %v454_v22  ;;  %v443_v22 = vld [vmem:[%s422_s10] sm:$0xff]  ;;  %s2028_s13 = scalar_lea.vmem %s2382_s26, 32 }
  0x42   : > { %1832 = vmatpush3.bf16.msra.mxu1 %v685_v23  ;;  %1825 = vmatprep.subr.bf16.mxu0 %v624_v28  ;;  %v865_v20 = vsel %vm481_vm1, %v458_v19, 0  ;;  %v444_v23 = vld [vmem:[%s422_s10 + $0x8] sm:$0xff]  ;;  %p2029_p6 = scmp.ne.s32.totalorder %s2382_s26, %s2028_s13 }
  0x43   : > { %1845 = vmatprep.subr.bf16.mxu1 %v2100_v17  ;;  %851 = vperm.xlu0 %1987, %v443_v22   ;;  %v941_v22 = vld [vmem:[#allocation2 + $0xb8] sm:$0xff] }
  0x44   : > { %p2030_p10 = pnand %p2029_p6, %p2441_p9 }
  0x45   : > { %1826 = vmatpush3.bf16.msra.mxu0 %v624_v28 }
  0x46   : > { %1837 = vmatprep.subr.bf16.mxu0 %v466_v52  ;;  %p2031_p12 = pneg %p2030_p10 }
  0x47   : > { %856 = vperm.xlu0 %1987, %v444_v23   ;;  %v942_v23 = vpack.c.bf16 %v941_v22, %v941_v22 }
 0x113   : > { %v1815_v32 = vpop.f32.mrb[0].mxu0 }
 0x114   : > { %v1821_v29 = vpop.f32.mrb[0].mxu1  ;;  %v530_v34 = vadd.f32 %v1815_v32, %v1709_v30  ;;  %v521_v35 = vpop.f32.mrb[1].mxu0 }
 0x115   : > { %v591_v31 = vpop.f32.mrb[1].mxu1  ;;  %v522_v38 = vadd.f32 %v1709_v30, %v521_v35  ;;  %v1816_v39 = vpop.f32.mrb[2].mxu0 }
 0x116   : > { %v1822_v33 = vpop.f32.mrb[2].mxu1  ;;  %v533_v41 = vadd.f32 %v1816_v39, %v1709_v30  ;;  %v524_v42 = vpop.f32.mrb[3].mxu0  ;;  %v538_v44 = vmax.f32 %v530_v34, 0.0  ;;  %v933_v39 = vld [vmem:[#allocation2 + $0x90] sm:$0xff] }
 0x117   : > { %v676_v36 = vpack.c.bf16 %v1822_v33, %v1821_v29  ;;  %v594_v37 = vpop.f32.mrb[3].mxu1  ;;  %v525_v43 = vadd.f32 %v1709_v30, %v524_v42  ;;  %v536_v46 = vmax.f32 %v522_v38, 0.0  ;;  %v929_v29 = vpack.c.bf16 %v928_v24, %v928_v24 }
 0x118   : > { %v675_v40 = vpack.c.bf16 %v594_v37, %v591_v31  ;;  %v539_v45 = vmax.f32 %v533_v41, 0.0  ;;  %v932_v37 = vld [vmem:[#allocation2 + $0x88] sm:$0xff]  ;;  %v1139_v24 = vsel %vm619_vm4, %v942_v23, 0 }
 0x119   : > { %v537_v47 = vmax.f32 %v525_v43, 0.0  ;;  %v961_v32 = vand.u32 %v929_v29, %v2253_v5  ;;  %v945_v29 = vld [vmem:[#allocation2 + $0xd0] sm:$0xff] }
 0x11a   : > { %1833 = vmatprep.mubr.msk.bf16.mxu1 %vm677_vm6, %v675_v40  ;;  %v607_v48 = vpack.c.bf16 %v539_v45, %v538_v44  ;;  %v934_v40 = vld [vmem:[#allocation2 + $0x98] sm:$0x1] }
 0x11b   : > { %1834 = vmatmul.mubr.msk.bf16.vlgmr.msra.gmra.mrb[4].mxu1 %vm677_vm6, %v676_v36  ;;  %v606_v49 = vpack.c.bf16 %v537_v47, %v536_v46  ;;  %v931_v36 = vld [vmem:[#allocation2 + $0x80] sm:$0xff]  ;;  %v936_v41 = vpack.c.bf16 %v934_v40, %v933_v39  ;;  %v948_v40 = vld [vmem:[#allocation2 + $0xe8] sm:$0xff] }
 0x11c   : > { %1849 = vmatprep.mubr.msk.bf16.mxu1 %vm2101_vm9, %v2100_v17  ;;  %v935_v38 = vpack.c.bf16 %v932_v37, %v931_v36  ;;  %v1726_v46 = vld [vmem:[#allocation2 + $0x40] ss:$0 sm:$0xff] }
 0x11d   : > { %1827 = vmatprep.mubr.msk.bf16.mxu0 %vm612_vm7, %v606_v49  ;;  %v1078_v42 = vand.u32 %v936_v41, %v2279_v27  ;;  %v947_v39 = vld [vmem:[#allocation2 + $0xe0] sm:$0xff] }
 0x11e   : > { %1828 = vmatmul.mubr.msk.bf16.vlgmr.msra.gmra.mrb[4].mxu0 %vm612_vm7, %v607_v48  ;;  %v953_v41 = vpack.c.bf16 %v948_v40, %v947_v39 }
 0x11f   : > { %1838 = vmatpush3.bf16.msra.mxu0 %v466_v52 }
 0x120   : > { %1839 = vmatprep.subr.bf16.mxu0 %v467_v55 }
 0x123   : > { %1840 = vmatpush3.bf16.msra.mxu0 %v467_v55 }
 0x124   : > { %1853 = vmatprep.subr.bf16.mxu0 %v2100_v17 }
 0x1ee   : > { %v1835_v56 = vpop.f32.mrb[4].mxu1 }
 0x1ef   : > { %v721_v57 = vpop.f32.mrb[5].mxu1 }
 0x1f0   : > { %v1836_v58 = vpop.f32.mrb[6].mxu1 }
 0x1f1   : > { %v724_v59 = vpop.f32.mrb[7].mxu1  ;;  %v1829_v61 = vpop.f32.mrb[4].mxu0 }
 0x1f2   : > { %v669_v62 = vadd.f32 %v1829_v61, %v1716_v60  ;;  %v660_v63 = vpop.f32.mrb[5].mxu0 }
 0x1f3   : > { %v661_v0 = vadd.f32 %v1716_v60, %v660_v63  ;;  %v1830_v1 = vpop.f32.mrb[6].mxu0 }
 0x1f4   : > { %v738_v2 = vmul.f32 %v1835_v56, %v669_v62  ;;  %v672_v3 = vadd.f32 %v1830_v1, %v1716_v60  ;;  %v663_v4 = vpop.f32.mrb[7].mxu0 }
 0x1f5   : > { %v736_v7 = vmul.f32 %v721_v57, %v661_v0  ;;  %v664_v9 = vadd.f32 %v1716_v60, %v663_v4 }
 0x1f6   : > { %v739_v10 = vmul.f32 %v1836_v58, %v672_v3 }
 0x1f7   : > { %v737_v11 = vmul.f32 %v724_v59, %v664_v9 }
 0x1f8   : > { %v741_v14 = vpack.c.bf16 %v739_v10, %v738_v2 }
 0x1f9   : > { %v740_v15 = vpack.c.bf16 %v737_v11, %v736_v7 }
 0x1fb   : > { %1841 = vmatprep.mubr.msk.bf16.mxu0 %vm742_vm8, %v740_v15 }
 0x1fc   : > { %1842 = vmatmul.mubr.msk.bf16.vlgmr.msra.gmra.mrb[8].mxu0 %vm742_vm8, %v741_v14 }
 0x1fd   : > { %1854 = vmatpush3.bf16.msra.mxu0 %v865_v20  ;;  %1855 = vmatprep.mubr.msk.bf16.mxu0 %vm2101_vm9, %v2100_v17 }
 0x204   : > { %1856 = vmatmul.mubr.msk.bf16.vlgmr.msra.gmra.mrb[12].mxu0 %vm677_vm6, %v2255_v6 }
 0x205   : > { %1867 = vmatprep.mubr.msk.bf16.mxu0 %vm550_vm2, %v2257_v8  ;;  %v2309_v8 = vld [vmem:[%s417_s24] sm:$0xff]   ;;  %s1751_s24 = sshll.u32 %s2170_s9, 5  ;;  %s1538_s9 = scalar_lea.sflag [#allocation4], %s395_s23 }
 0x206   : > { %s2380_s12 = scalar_lea.hbm %s2430_s8, %s1751_s24 }
 0x2cf   : > { %v1843_v25 = vpop.f32.mrb[8].mxu0 }
 0x2d0   : > { %v783_v26 = vpop.f32.mrb[9].mxu0 }
 0x2d1   : > { %v1844_v28 = vpop.f32.mrb[10].mxu0 }
 0x2d2   : > { %v799_v6 = vpack.c.bf16 %v1844_v28, %v1843_v25  ;;  %v786_v30 = vpop.f32.mrb[11].mxu0  ;;  %v943_v25 = vld [vmem:[#allocation2 + $0xc0] sm:$0xff] }
 0x2d3   : > { %v798_v31 = vpack.c.bf16 %v786_v30, %v783_v26  ;;  %v944_v26 = vld [vmem:[#allocation2 + $0xc8] sm:$0xff] }
 0x2d4   : > { %v951_v28 = vpack.c.bf16 %v944_v26, %v943_v25 }
 0x2d5   : > { %1846 = vmatpush3.bf16.msra.mxu1 %v798_v31 }
 0x2d6   : > { %1847 = vmatprep.subr.bf16.mxu1 %v2100_v17 }
 0x2d7   : > { %v901_v33 = vpop.f32.mrb[12].mxu0 }
 0x2d8   : > { %v1857_v34 = vpop.f32.mrb[13].mxu0 }
 0x2d9   : > { %1848 = vmatpush3.bf16.msra.mxu1 %v799_v6  ;;  %v904_v35 = vpop.f32.mrb[14].mxu0  ;;  %v946_v6 = vld [vmem:[#allocation2 + $0xd8] sm:$0xff] }
 0x2da   : > { %1859 = vmatprep.subr.bf16.mxu1 %v961_v32  ;;  %v1858_v5 = vpop.f32.mrb[15].mxu0  ;;  %v952_v30 = vpack.c.bf16 %v946_v6, %v945_v29 }
 0x2dc   : > { %1850 = vmatmul.mubr.msk.bf16.vlgmr.msra.gmra.mrb[8].mxu1 %vm742_vm8, %v2309_v8 }
 0x2dd   : > { %1860 = vmatpush3.bf16.msra.mxu1 %v961_v32  ;;  %1861 = vmatprep.mubr.msk.bf16.mxu1 %vm473_vm3, %v2261_v12  ;;  %v2318_v12 = vpop.permute.xlu0 %851 }
 0x2de   : > { %1871 = vmatprep.subr.bf16.mxu1 %v935_v38 }
 0x2e1   : > { %v2321_v45 = vpop.permute.xlu0 %856 }
 0x2e4   : > { %1862 = vmatmul.mubr.msk.bf16.vlgmr.msra.gmra.mrb[12].mxu1 %vm473_vm3, %v2270_v16 }
 0x2e5   : > { %1872 = vmatpush3.bf16.msra.mxu1 %v935_v38 }
 0x2e6   : > { %1873 = vmatprep.subr.bf16.mxu1 %v1078_v42 }
 0x2e9   : > { %1874 = vmatpush3.bf16.msra.mxu1 %v1078_v42  ;;  %v949_v42 = vld [vmem:[#allocation2 + $0xf0] sm:$0xff] }
 0x2ea   : > { %1885 = vmatprep.subr.bf16.mxu1 %v951_v28 }
 0x3af   : > { %v842_v43 = vpop.f32.mrb[8].mxu1 }
 0x3b0   : > { %v859_v16 = vmul.f32 %v2318_v12, %v842_v43  ;;  %v1851_v44 = vpop.f32.mrb[9].mxu1  ;;  %v950_v43 = vld [vmem:[#allocation2 + $0xf8] sm:$0xff] }
 0x3b1   : > { %v845_v47 = vpop.f32.mrb[10].mxu1  ;;  %v1734_v44 = vld [vmem:[#allocation2 + $0xa0] ss:$0 sm:$0xff] }
 0x3b2   : > { %v908_v48 = vadd.f32 %v901_v33, %v859_v16  ;;  %v860_v49 = vmul.f32 %v2321_v45, %v845_v47  ;;  %v1852_v50 = vpop.f32.mrb[11].mxu1  ;;  %v954_v16 = vpack.c.bf16 %v950_v43, %v949_v42 }
 0x3b4   : > { %v914_v51 = vadd.f32 %v1726_v46, %v908_v48  ;;  %v909_v52 = vadd.f32 %v904_v35, %v860_v49 }
 0x3b6   : > { %v918_v27 = vmin.f32 %v914_v51, 0.0  ;;  %v915_v54 = vadd.f32 %v1726_v46, %v909_v52  ;;  %vm916_vm10 = vcmp.gt.f32.partialorder %v914_v51, 0.0 }
 0x3b7   : > { %v1863_v55 = vpop.f32.mrb[12].mxu1 }
 0x3b8   : > { %v920_v56 = vmul.f32 1.442695, %v918_v27  ;;  %v919_v57 = vmin.f32 %v915_v54, 0.0  ;;  %v1006_v58 = vadd.f32 %v1863_v55, %v1729_v53  ;;  %v997_v59 = vpop.f32.mrb[13].mxu1  ;;  %vm917_vm11 = vcmp.gt.f32.partialorder %v915_v54, 0.0 }
 0x3b9   : > { %v998_v60 = vadd.f32 %v1729_v53, %v997_v59  ;;  %v1864_v61 = vpop.f32.mrb[14].mxu1 }
 0x3ba   : > { %1992 = vpow2.f32 %v920_v56  ;;  %v922_v62 = vmul.f32 1.442695, %v919_v57  ;;  %v1014_v63 = vmax.f32 %v1006_v58, 0.0  ;;  %v1009_v0 = vadd.f32 %v1864_v61, %v1729_v53  ;;  %v1000_v1 = vpop.f32.mrb[15].mxu1 }
 0x3bb   : > { %v1012_v2 = vmax.f32 %v998_v60, 0.0  ;;  %v1001_v3 = vadd.f32 %v1729_v53, %v1000_v1  ;;  %v938_v1 = vld [vmem:[#allocation2 + $0xa8] sm:$0xff] }
 0x3bc   : > { %1994 = vpow2.f32 %v922_v62  ;;  %v1015_v4 = vmax.f32 %v1009_v0, 0.0 }
 0x3bd   : > { %v1013_v7 = vmax.f32 %v1001_v3, 0.0 }
 0x3be   : > { %v1066_v9 = vpack.c.bf16 %v1015_v4, %v1014_v63  ;;  %v1433_v4 = vld [vmem:[#allocation2 + $0x108] sm:$0xff] }
 0x3bf   : > { %v1065_v10 = vpack.c.bf16 %v1013_v7, %v1012_v2  ;;  %v939_v2 = vpack.c.bf16 %v938_v1, %v938_v1  ;;  %v1434_v7 = vpack.c.bf16 %v1433_v4, %v1433_v4  ;;  %v1749_v1 = vld [vmem:[#allocation2 + $0x110] ss:$0 sm:$0xff] }
 0x3c1   : > { %1875 = vmatprep.mubr.msk.bf16.mxu1 %vm612_vm7, %v1065_v10  ;;  %v1301_v3 = vsel %vm619_vm4, %v939_v2, 0 }
 0x3c2   : > { %1876 = vmatmul.mubr.msk.bf16.vlgmr.msra.gmra.mrb[16].mxu1 %vm612_vm7, %v1066_v9  ;;  %v1442_v9 = vsel %vm619_vm4, %v1434_v7, 0 }
 0x3c3   : > { %1886 = vmatpush3.bf16.msra.mxu1 %v951_v28 }
 0x3c4   : > { %v1993_v11 = vpop.eup %1992  ;;  %1887 = vmatprep.subr.bf16.mxu1 %v952_v30 }
 0x3c5   : > { %v1727_v14 = vadd.f32 -1.0, %v1993_v11 }
 0x3c6   : > { %v1995_v15 = vpop.eup %1994 }
 0x3c7   : > { %v1728_v18 = vadd.f32 -1.0, %v1995_v15  ;;  %v926_v19 = vsel %vm916_vm10, %v914_v51, %v1727_v14  ;;  %1888 = vmatpush3.bf16.msra.mxu1 %v952_v30 }
 0x3c8   : > { %1889 = vmatprep.subr.bf16.mxu1 %v953_v41 }
 0x3c9   : > { %v927_v20 = vsel %vm917_vm11, %v915_v54, %v1728_v18 }
 0x3ca   : > { %v2326_v21 = vpack.c.bf16 %v927_v20, %v926_v19  ;;  %v1743_v19 = vld [vmem:[#allocation2 + $0xb0] ss:$0 sm:$0xff] }
 0x3cb   : > { %1890 = vmatpush3.bf16.msra.mxu1 %v953_v41  ;;  %v1364_v41 = vld [vmem:[%s425_s17] sm:$0x1] }
 0x3cc   : > { %1865 = vmatprep.subr.bf16.mxu0 %v2326_v21  ;;  %1891 = vmatprep.subr.bf16.mxu1 %v954_v16 }
 0x3cd   : > { %1866 = vmatpush3.bf16.msra.mxu0 %v2326_v21 }
 0x3ce   : > { %1930 = vmatprep.subr.msk.bf16.mxu0 %vm619_vm4, %v942_v23 }
 0x3cf   : > { %1892 = vmatpush3.bf16.msra.mxu1 %v954_v16 }
 0x3d0   : > { %1868 = vmatmul.mubr.msk.bf16.vlgmr.msra.gmra.mrb[16].mxu0 %vm550_vm2, %v2263_v13  ;;  %1911 = vmatprep.subr.bf16.mxu1 %v2100_v17 }
 0x3d1   : > { %1880 = vmatpush3.bf16.msra.mxu0 %v1139_v24 }
 0x3d2   : > { %1897 = vmatprep.subr.bf16.mxu0 %v2100_v17 }
 0x495   : > { %v1877_v13 = vpop.f32.mrb[16].mxu1 }
 0x496   : > { %v1114_v31 = vpop.f32.mrb[17].mxu1  ;;  %v1123_v46 = vadd.f32 %v1877_v13, %v1734_v44 }
 0x497   : > { %v1878_v32 = vpop.f32.mrb[18].mxu1  ;;  %v1115_v47 = vadd.f32 %v1734_v44, %v1114_v31 }
 0x498   : > { %v1117_v33 = vpop.f32.mrb[19].mxu1  ;;  %v1126_v49 = vadd.f32 %v1878_v32, %v1734_v44 }
 0x499   : > { %v1118_v52 = vadd.f32 %v1734_v44, %v1117_v33 }
 0x4a3   : > { %v1869_v34 = vpop.f32.mrb[16].mxu0 }
 0x4a4   : > { %v1050_v35 = vpop.f32.mrb[17].mxu0 }
 0x4a5   : > { %v1870_v5 = vpop.f32.mrb[18].mxu0 }
 0x4a6   : > { %v1130_v36 = vpack.c.bf16 %v1870_v5, %v1869_v34  ;;  %v1053_v37 = vpop.f32.mrb[19].mxu0 }
 0x4a7   : > { %v1129_v38 = vpack.c.bf16 %v1053_v37, %v1050_v35 }
 0x4a9   : > { %1881 = vmatprep.mubr.msk.bf16.mxu0 %vm1131_vm12, %v1129_v38 }
 0x4aa   : > { %1882 = vmatmul.mubr.msk.bf16.vlgmr.msra.gmra.mrb[20].mxu0 %vm1131_vm12, %v1130_v36 }
 0x4ab   : > { %1901 = vmatprep.mubr.msk.bf16.mxu0 %vm2101_vm9, %v2100_v17 }
 0x57d   : > { %v1883_v48 = vpop.f32.mrb[20].mxu0 }
 0x57e   : > { %v1192_v50 = vmul.f32 %v1883_v48, %v1123_v46  ;;  %v1175_v51 = vpop.f32.mrb[21].mxu0 }
 0x57f   : > { %v1190_v53 = vmul.f32 %v1175_v51, %v1115_v47  ;;  %v1884_v27 = vpop.f32.mrb[22].mxu0 }
 0x580   : > { %v1193_v54 = vmul.f32 %v1884_v27, %v1126_v49  ;;  %v1178_v55 = vpop.f32.mrb[23].mxu0 }
 0x581   : > { %v1191_v56 = vmul.f32 %v1178_v55, %v1118_v52 }
 0x582   : > { %v1195_v57 = vpack.c.bf16 %v1193_v54, %v1192_v50 }
 0x583   : > { %v1194_v58 = vpack.c.bf16 %v1191_v56, %v1190_v53  ;;  %v1431_v53 = vld [vmem:[#allocation2 + $0x100] sm:$0xff] }
 0x584   : > { %v1432_v27 = vpack.c.bf16 %v1431_v53, %v1431_v53 }
 0x585   : > { %1893 = vmatprep.mubr.msk.bf16.mxu1 %vm1196_vm13, %v1194_v58 }
 0x586   : > { %1894 = vmatmul.mubr.msk.bf16.vlgmr.msra.gmra.mrb[20].mxu1 %vm1196_vm13, %v1195_v57  ;;  %v1488_v54 = vsel %vm619_vm4, %v1432_v27, 0 }
 0x587   : > { %1913 = vmatprep.mubr.msk.bf16.mxu1 %vm2101_vm9, %v2100_v17 }
 0x659   : > { %v1895_v59 = vpop.f32.mrb[20].mxu1 }
 0x65a   : > { %v1237_v60 = vpop.f32.mrb[21].mxu1 }
 0x65b   : > { %v1896_v61 = vpop.f32.mrb[22].mxu1 }
 0x65c   : > { %v1253_v62 = vpack.c.bf16 %v1896_v61, %v1895_v59  ;;  %v1240_v63 = vpop.f32.mrb[23].mxu1 }
 0x65d   : > { %v1252_v0 = vpack.c.bf16 %v1240_v63, %v1237_v60 }
 0x65f   : > { %1898 = vmatpush3.bf16.msra.mxu0 %v1252_v0 }
 0x660   : > { %1899 = vmatprep.subr.bf16.mxu0 %v2100_v17 }
 0x663   : > { %1900 = vmatpush3.bf16.msra.mxu0 %v1253_v62 }
 0x664   : > { %1905 = vmatprep.subr.bf16.mxu0 %v2100_v17 }
 0x666   : > { %1902 = vmatmul.mubr.msk.bf16.vlgmr.msra.gmra.mrb[24].mxu0 %vm742_vm8, %v2309_v8  ;;  %v1409_v8 = vld [vmem:[%s429_s18] sm:$0x3]  ;;  %s2103_s18 = smov [#allocation5]  }
 0x667   : > { %1906 = vmatpush3.bf16.msra.mxu0 %v1301_v3  ;;  %1907 = vmatprep.mubr.msk.bf16.mxu0 %vm2101_vm9, %v2100_v17  ;;  %s2032_s21 = sshll.u32 %s2103_s18, 4  ;;  %s2033_s21 = int_to_ptr.vmem [resolvable:$false] %s2032_s21 }
 0x668   : > { %1917 = vmatprep.subr.bf16.mxu0 %v2100_v17  ;;  %1412 = vperm.xlu1 %1988, %v1409_v8   ;;  %s2034_s22 = scalar_lea.vmem %s2033_s21, 64  ;;  %p2035_p2 = scmp.lt.s32.totalorder %s2382_s26, %s2033_s21 }
 0x669   : > { %p2036_p3 = scmp.lt.s32.totalorder %s2034_s22, %s2028_s13 }
 0x66b   : > { %p2037_p4 = por %p2036_p3, %p2035_p2 }
 0x66d   : > { %p2038_p7 = pnand %p2037_p4, %p2031_p12 }
 0x66e   : > { %1908 = vmatmul.mubr.msk.bf16.vlgmr.msra.gmra.mrb[28].mxu0 %vm1131_vm12, %v2326_v21 }
 0x66f   : > { %1919 = vmatprep.mubr.msk.bf16.mxu0 %vm2101_vm9, %v2100_v17  ;;  %1918 = vmatpush3.bf16.msra.mxu0 %v1442_v9 }
 0x6e7   : > { %v1413_v55 = vpop.permute.xlu1 %1412 }
 0x739   : > { %v1288_v10 = vpop.f32.mrb[24].mxu0 }
 0x73a   : > { %v1903_v11 = vpop.f32.mrb[25].mxu0  ;;  %v1295_v18 = vmul.f32 %v1288_v10, %v2318_v12 }
 0x73b   : > { %v1291_v14 = vpop.f32.mrb[26].mxu0 }
 0x73c   : > { %v1904_v15 = vpop.f32.mrb[27].mxu0  ;;  %v1296_v21 = vmul.f32 %v1291_v14, %v2321_v45 }
 0x741   : > { %v1337_v20 = vpop.f32.mrb[28].mxu0 }
 0x742   : > { %v1344_v22 = vadd.f32 %v1337_v20, %v1295_v18  ;;  %v1909_v23 = vpop.f32.mrb[29].mxu0 }
 0x743   : > { %v1340_v24 = vpop.f32.mrb[30].mxu0 }
 0x744   : > { %v1350_v25 = vadd.f32 %v1743_v19, %v1344_v22  ;;  %v1345_v26 = vadd.f32 %v1340_v24, %v1296_v21  ;;  %v1910_v28 = vpop.f32.mrb[31].mxu0 }
 0x746   : > { %v1354_v29 = vmin.f32 %v1350_v25, 0.0  ;;  %v1351_v6 = vadd.f32 %v1743_v19, %v1345_v26  ;;  %vm1352_vm14 = vcmp.gt.f32.partialorder %v1350_v25, 0.0 }
 0x748   : > { %v1356_v30 = vmul.f32 1.442695, %v1354_v29  ;;  %v1355_v13 = vmin.f32 %v1351_v6, 0.0  ;;  %vm1353_vm15 = vcmp.gt.f32.partialorder %v1351_v6, 0.0 }
 0x74a   : > { %1996 = vpow2.f32 %v1356_v30  ;;  %v1358_v31 = vmul.f32 1.442695, %v1355_v13 }
 0x74c   : > { %1998 = vpow2.f32 %v1358_v31 }
 0x754   : > { %v1997_v32 = vpop.eup %1996 }
 0x755   : > { %v1744_v12 = vadd.f32 -1.0, %v1997_v32 }
 0x756   : > { %v1999_v33 = vpop.eup %1998 }
 0x757   : > { %v1362_v34 = vsel %vm1352_vm14, %v1350_v25, %v1744_v12  ;;  %v1745_v45 = vadd.f32 -1.0, %v1999_v33 }
 0x758   : > { %v1416_v35 = vsel %vm1131_vm12, %v1362_v34, -inf }
 0x759   : > { %v1417_v5 = vrot.slane %v1416_v35, 4  ;;  %v1363_v36 = vsel %vm1353_vm15, %v1351_v6, %v1745_v45 }
 0x75a   : > { %v1423_v37 = vsel %vm1131_vm12, %v1363_v36, -inf  ;;  %v1365_v38 = vpack.c.bf16 %v1363_v36, %v1362_v34 }
 0x75b   : > { %v1418_v39 = vmax.f32 %v1416_v35, %v1417_v5  ;;  %v1424_v40 = vrot.slane %v1423_v37, 4 }
 0x75c   : > { %1912 = vmatpush3.bf16.msra.mxu1 %v1365_v38 }
 0x75d   : > { %v1419_v42 = vrot.slane %v1418_v39, 2  ;;  %v1425_v43 = vmax.f32 %v1423_v37, %v1424_v40  ;;  %1923 = vmatprep.subr.bf16.mxu1 %v2100_v17 }
 0x75f   : > { %v1420_v16 = vmax.f32 %v1418_v39, %v1419_v42  ;;  %v1426_v44 = vrot.slane %v1425_v43, 2  ;;  %1914 = vmatmul.mubr.msk.bf16.vlgmr.msra.gmra.mrb[24].mxu1 %vm550_vm2, %v1364_v41 }
 0x760   : > { %1925 = vmatprep.mubr.msk.bf16.mxu1 %vm2101_vm9, %v2100_v17  ;;  %1924 = vmatpush3.bf16.msra.mxu1 %v1488_v54 }
 0x761   : > { %v1421_v46 = vrot.slane %v1420_v16, 1  ;;  %v1427_v47 = vmax.f32 %v1425_v43, %v1426_v44 }
 0x763   : > { %v1428_v48 = vrot.slane %v1427_v47, 1  ;;  %v1422_v49 = vmax.f32 %v1420_v16, %v1421_v46 }
 0x765   : > { %v1429_v50 = vmax.f32 %v1427_v47, %v1428_v48 }
 0x767   : > { %v1430_v51 = vsel %vm480_vm0, %v1422_v49, %v1429_v50  ;;  %vm1535_vm0 = vcmask 17408  }
 0x768   : > { %v1437_v52 = vpack.c.bf16 %v1430_v51, %v1430_v51 }
 0x76a   : > { %1920 = vmatmul.mubr.msk.bf16.vlgmr.msra.gmra.mrb[32].mxu0 %vm1131_vm12, %v1437_v52 }
 0x832   : > { %v1403_v56 = vpop.f32.mrb[24].mxu1 }
 0x833   : > { %v1415_v17 = vmul.f32 %v1413_v55, %v1403_v56  ;;  %v1915_v57 = vpop.f32.mrb[25].mxu1 }
 0x834   : > { %v1406_v58 = vpop.f32.mrb[26].mxu1 }
 0x835   : > { %v1436_v59 = vpack.c.bf16 %v1415_v17, %v1415_v17  ;;  %v1916_v60 = vpop.f32.mrb[27].mxu1 }
 0x837   : > { %1926 = vmatmul.mubr.msk.bf16.vlgmr.msra.gmra.mrb[28].mxu1 %vm1131_vm12, %v1436_v59 }
 0x83d   : > { %v1478_v61 = vpop.f32.mrb[32].mxu0 }
 0x83e   : > { %v1921_v62 = vpop.f32.mrb[33].mxu0 }
 0x83f   : > { %v1481_v63 = vpop.f32.mrb[34].mxu0 }
 0x840   : > { %v1922_v0 = vpop.f32.mrb[35].mxu0 }
 0x90a   : > { %v1524_v2 = vpop.f32.mrb[28].mxu1 }
 0x90b   : > { %v1525_v3 = vadd.f32 %v1524_v2, %v1478_v61  ;;  %v1927_v4 = vpop.f32.mrb[29].mxu1 }
 0x90c   : > { %v1527_v7 = vpop.f32.mrb[30].mxu1 }
 0x90d   : > { %v1534_v9 = vadd.f32 %v1749_v1, %v1525_v3  ;;  %v1928_v8 = vpop.f32.mrb[31].mxu1 }
 0x90f   : > { %1536 = vst.msk [vmem:[%s397_s25] sm:$0x3] %vm1535_vm0, %v1534_v9 }
 0x910   : > { %2041 = shalt.err (!%p2038_p7)
}
 0x911   : > { %s2042_s17 = scalar_lea.hbm %s2380_s12, 32  ;;  %s2046_s24 = scalar_lea.hbm %s2430_s8, 64 }
 0x912   : > { %p2043_p8 = scmp.ne.s32.totalorder %s2380_s12, %s2042_s17  ;;  %p2047_p1 = scmp.lt.u32.totalorder %s2380_s12, %s2430_s8 }
 0x913   : > { %p2048_p0 = scmp.lt.u32.totalorder %s2046_s24, %s2042_s17  ;;  %p2050_p6 = scmp.lt.u32.totalorder %s2042_s17, %s2380_s12 }
 0x914   : > { %p2044_p11 = pnand %p2043_p8, %p2441_p9 }
 0x915   : > { %p2049_p5 = por %p2048_p0, %p2047_p1 }
 0x916   : > { %p2045_p13 = pneg %p2044_p11 }
 0x917   : > { %p2051_p10 = por %p2050_p6, %p2049_p5 }
 0x919   : > { %p2052_p12 = pnand %p2051_p10, %p2045_p13 }
 0x91b   : > { %2055 = shalt.err (!%p2052_p12)
}
 0x91c   : > { %1935 = dma.vmem_to_hbm [thread:$0]  (%p2441_p9), %s2382_s26, 32, %s2380_s12, %s1538_s9  }
 0x91d PF: > { %p1947_p2 = scmp.ge.s32.totalorder %s2094_s30, 2  ;;  %s1563_s20 = sand.u32 1, %s2082_s27  }
 0x91e   : > { %p2442_p3 = scmp.ne.s32.totalorder %s2435_s16, 0  ;;  %s1564_s13 = scalar_lea.sflag [#allocation4], %s1563_s20 }
 0x920   : > { %p1942_p4 = pnand %p1947_p2, %p2442_p3 }
 0x922   : > { %2077 = dma.done.wait (!%p1942_p4), %s1564_s13, 32  }
 0x923   : > { %2079 = vsyncadd (!%p1942_p4), %s1564_s13, 4294967264  ;;  %p19_p7 = scmp.ge.s32.totalorder %s2174_s11, 4   ;;  %s2443_s27 = smov %s2086_s28 }
 0x924   : > { %s2444_s28 = smov %s2090_s29  ;;  %s2445_s29 = smov %s2185_s14 }
 0x925   : > { %s2446_s30 = smov %s2174_s11  ;;  %21 = sbr.rel (!%p19_p7) target bundleno = 4 (0x4), region = 110 }
 0x92c   :  { %1569 = vsyncpa [#allocation3], 1 }
 0x92d   :  { %1571 = vsyncpa [#allocation3 + $0x1], 1 }
 0x92e   :  { %1572 = vsyncpa [#allocation4], 1 }
 0x92f   :  { %1574 = vsyncpa [#allocation4 + $0x1], 1 }

</bundles_post_ra>
